<compile_context>
chip_gen: v6e
topology: v6e:2x2x1
jax: 0.10.0
libtpu: 0.0.40
codegen_flags: <defaults>
</compile_context>

<pallas_src>
import math

import jax
import jax.numpy as jnp
from jax.experimental import pallas as pl
from jax.experimental.pallas import tpu as pltpu


# ---------------------------------------------------------------------------
# VMEM limit derived from the local chip (v5e/v6e: 128 MiB, v7x: 64 MiB)
# ---------------------------------------------------------------------------
def _vmem_limit_bytes(frac=0.7, default=48 << 20, cap=100 << 20):
    try:
        physical = pltpu.get_tpu_info().vmem_capacity_bytes
        return int(min(physical * frac, cap))
    except Exception:   # info query unavailable -> conservative, v7x-safe value
        return default


# ---------------------------------------------------------------------------
# Linear:  y = x @ W + b     (W laid out as (d_in, d_out)), M- and N-tiled
# ---------------------------------------------------------------------------
def _linear_kernel(x_ref, w_ref, b_ref, o_ref):
    y = jnp.dot(x_ref[...], w_ref[...], preferred_element_type=jnp.float32)
    o_ref[...] = (y + b_ref[...].astype(jnp.float32)).astype(o_ref.dtype)


def _linear_tiles(rows, d_in, d_out, in_itemsize, out_itemsize,
                  budget_bytes=24 << 20):
    # N tile: keep the weight block narrow (fused QKV weight is (d, 3d)) and
    # 256-aligned for the 256x256 MXU; fall back to full width when small.
    if d_out > 512 and d_out % 512 == 0:
        block_n = 512
    elif d_out > 256 and d_out % 256 == 0:
        block_n = 256
    else:
        block_n = d_out

    # M tile from a VMEM budget that counts double-buffered x/out tiles plus
    # the (double-buffered) weight + bias block.
    w_bytes = 2 * (d_in * block_n * in_itemsize + block_n * 4)
    per_row = 2 * (d_in * in_itemsize + block_n * out_itemsize)
    avail = max(budget_bytes - w_bytes, 0)
    block_m = avail // max(per_row, 1)
    block_m = int(min(block_m, 1024, pl.cdiv(rows, 8) * 8))
    if block_m >= 256:
        block_m = (block_m // 256) * 256        # MXU-aligned when big enough
    else:
        block_m = (block_m // 8) * 8
    block_m = max(block_m, min(128, pl.cdiv(rows, 8) * 8), 8)
    return int(block_m), int(block_n)


def _linear(x2d, w_t, b, *, out_dtype=None):
    """x2d: (rows, d_in); w_t: (d_in, d_out); b: (d_out,) -> (rows, d_out)."""
    rows, d_in = x2d.shape
    d_out = w_t.shape[1]
    out_dtype = out_dtype or x2d.dtype

    block_m, block_n = _linear_tiles(
        rows, d_in, d_out,
        jnp.dtype(x2d.dtype).itemsize, jnp.dtype(out_dtype).itemsize)

    rows_padded = pl.cdiv(rows, block_m) * block_m
    if rows_padded != rows:     # pad rows instead of shrinking the tile
        x2d = jnp.pad(x2d, ((0, rows_padded - rows), (0, 0)))

    out = pl.pallas_call(
        _linear_kernel,
        out_shape=jax.ShapeDtypeStruct((rows_padded, d_out), out_dtype),
        grid_spec=pltpu.PrefetchScalarGridSpec(
            num_scalar_prefetch=0,
            grid=(rows_padded // block_m, d_out // block_n),
            in_specs=[
                pl.BlockSpec((block_m, d_in), lambda i, j: (i, 0)),
                pl.BlockSpec((d_in, block_n), lambda i, j: (0, j)),
                pl.BlockSpec((1, block_n), lambda i, j: (0, j)),
            ],
            out_specs=pl.BlockSpec((block_m, block_n), lambda i, j: (i, j)),
        ),
        compiler_params=pltpu.CompilerParams(
            dimension_semantics=("parallel", "parallel"),
            vmem_limit_bytes=_vmem_limit_bytes(),
        ),
    )(x2d, w_t, b.reshape(1, d_out))
    return out[:rows] if rows_padded != rows else out


# ---------------------------------------------------------------------------
# Attention: one (batch, head, q_block) tile per grid step; RoPE + softmax
# in-kernel; K/V for the current (batch, head) fully resident.
# ---------------------------------------------------------------------------
def _pick_block_q(seq):
    for c in (256, 128, 64, 32, 16, 8):
        if seq % c == 0:
            return c
    return seq      # fall back to a single full-sequence block


def _make_attn_kernel(scale, half, block_q, with_mask):
    def kernel(*refs):
        if with_mask:
            q_ref, k_ref, v_ref, cos_ref, sin_ref, m_ref, o_ref, p_ref = refs
        else:
            q_ref, k_ref, v_ref, cos_ref, sin_ref, o_ref, p_ref = refs
            m_ref = None

        cdt = q_ref.dtype            # keep MXU operands in the input dtype
        row0 = pl.multiple_of(pl.program_id(2) * block_q, block_q)

        cos_q = cos_ref[pl.ds(row0, block_q), :]        # (block_q, D) f32
        sin_q = sin_ref[pl.ds(row0, block_q), :]
        cos_k = cos_ref[...]                            # (S, D) f32
        sin_k = sin_ref[...]

        def rope(x, c, sgn_sin):
            # non-interleaved rotary: [x1*cos - x2*sin, x1*sin + x2*cos]
            #   = x * cos_full + roll(x, D/2) * sin_signed   (sign in table)
            return x * c + pltpu.roll(x, shift=half, axis=1) * sgn_sin

        q = q_ref[...].astype(jnp.float32)              # (block_q, D)
        k = k_ref[...].astype(jnp.float32)              # (S, D)
        qr = (rope(q, cos_q, sin_q) * scale).astype(cdt)   # fold 1/sqrt(D) into Q
        kr = rope(k, cos_k, sin_k).astype(cdt)

        # scores: (block_q, S) = qr @ kr^T  (contract head_dim on the MXU)
        scores = jax.lax.dot_general(qr, kr, (((1,), (1,)), ((), ())),
                                     preferred_element_type=jnp.float32)
        if m_ref is not None:
            scores = jnp.where(m_ref[...] != 0, jnp.float32(-1e10), scores)

        scores = scores - jnp.max(scores, axis=-1, keepdims=True)
        e = jnp.exp(scores)
        p = e * pl.reciprocal(jnp.sum(e, axis=-1, keepdims=True), approx=True)

        o = jnp.dot(p.astype(v_ref.dtype), v_ref[...],
                    preferred_element_type=jnp.float32)

        o_ref[...] = o.astype(o_ref.dtype)
        p_ref[...] = p.astype(p_ref.dtype)

    return kernel


# ---------------------------------------------------------------------------
# Full MHA forward
# ---------------------------------------------------------------------------
def mha_forward(params, n_heads, Q, K, V, mask=None):
    """Pallas forward of the PyTorch MHA module.

    params: torch-layout weights wq/wk/wv/wo of shape (out, in) and biases.
    Q, K, V: (batch, seq, d_model).   Returns (out, attention_dist).
    """
    batch, seq, d_model = Q.shape
    head_dim = d_model // n_heads
    assert d_model % n_heads == 0 and head_dim % 2 == 0
    dtype = Q.dtype

    wq_t, wk_t, wv_t = params["wq"].T, params["wk"].T, params["wv"].T

    # Fused QKV projection for self-attention (one HBM pass over activations).
    # NOTE: keyed on object identity — under jit with distinct tracers it
    # falls back to three projections (perf only, not correctness).
    if (Q is K) and (Q is V):
        x2d = Q.reshape(batch * seq, d_model)
        w_qkv = jnp.concatenate([wq_t, wk_t, wv_t], axis=1)
        b_qkv = jnp.concatenate([params["bq"], params["bk"], params["bv"]])
        qkv = _linear(x2d, w_qkv, b_qkv)
        q2d, k2d, v2d = jnp.split(qkv, 3, axis=1)
    else:
        q2d = _linear(Q.reshape(batch * seq, d_model), wq_t, params["bq"])
        k2d = _linear(K.reshape(batch * seq, d_model), wk_t, params["bk"])
        v2d = _linear(V.reshape(batch * seq, d_model), wv_t, params["bv"])

    # (B*S, d_model) -> (B, H, S, D).
    # TODO(synk): fold these transposes into the attention BlockSpecs (squeeze
    # the head axis in the index_map) once sub-lane-width head blocks are safe.
    def to_heads(t2d):
        return t2d.reshape(batch, seq, n_heads, head_dim).transpose(0, 2, 1, 3)

    q, k, v = to_heads(q2d), to_heads(k2d), to_heads(v2d)

    # Full-width rotary tables so in-kernel RoPE is roll (XLU) + 2 multiplies.
    half = head_dim // 2
    inv_freq = 1.0 / (10000.0 ** (jnp.arange(half, dtype=jnp.float32) / half))
    freqs = jnp.arange(seq, dtype=jnp.float32)[:, None] * inv_freq[None, :]
    cos_full = jnp.concatenate([jnp.cos(freqs), jnp.cos(freqs)], axis=-1)      # (S, D)
    sin_signed = jnp.concatenate([-jnp.sin(freqs), jnp.sin(freqs)], axis=-1)   # (S, D)

    block_q = _pick_block_q(seq)
    n_q = seq // block_q
    scale = 1.0 / math.sqrt(head_dim)
    with_mask = mask is not None

    in_specs = [
        pl.BlockSpec((None, None, block_q, head_dim), lambda b, h, i: (b, h, i, 0)),
        pl.BlockSpec((None, None, seq, head_dim), lambda b, h, i: (b, h, 0, 0)),
        pl.BlockSpec((None, None, seq, head_dim), lambda b, h, i: (b, h, 0, 0)),
        pl.BlockSpec((seq, head_dim), lambda b, h, i: (0, 0)),
        pl.BlockSpec((seq, head_dim), lambda b, h, i: (0, 0)),
    ]
    args = [q, k, v, cos_full, sin_signed]
    if with_mask:
        # Single (S, S) int8 mask shared across batch/heads — no B*H*S^2
        # float32 broadcast in HBM.
        m = jnp.asarray(mask)
        while m.ndim > 2:
            # TODO(synk): per-batch / per-head masks need a per-(b,h) index.
            assert m.shape[0] == 1, "only masks broadcastable to (S, S) supported"
            m = m[0]
        m2d = jnp.broadcast_to(m, (seq, seq)).astype(jnp.int8)
        in_specs.append(pl.BlockSpec((block_q, seq), lambda b, h, i: (i, 0)))
        args.append(m2d)

    attn_out, attn_dist = pl.pallas_call(
        _make_attn_kernel(scale, half, block_q, with_mask),
        out_shape=(
            jax.ShapeDtypeStruct((batch, n_heads, seq, head_dim), dtype),
            jax.ShapeDtypeStruct((batch, n_heads, seq, seq), dtype),
        ),
        grid_spec=pltpu.PrefetchScalarGridSpec(
            num_scalar_prefetch=0,
            grid=(batch, n_heads, n_q),
            in_specs=in_specs,
            out_specs=[
                pl.BlockSpec((None, None, block_q, head_dim),
                             lambda b, h, i: (b, h, i, 0)),
                pl.BlockSpec((None, None, block_q, seq),
                             lambda b, h, i: (b, h, i, 0)),
            ],
        ),
        compiler_params=pltpu.CompilerParams(
            dimension_semantics=("parallel", "parallel", "parallel"),
            vmem_limit_bytes=_vmem_limit_bytes(),
        ),
    )(*args)

    # (B, H, S, D) -> (B, S, H*D), then output projection fc_o.
    ctx = attn_out.transpose(0, 2, 1, 3).reshape(batch * seq, d_model)
    out = _linear(ctx, params["wo"].T, params["bo"])
    return out.reshape(batch, seq, d_model), attn_dist


# ---------------------------------------------------------------------------
# Demo / self-check
# ---------------------------------------------------------------------------
if __name__ == "__main__":
    batch, seq, d_model, n_heads = 2, 8, 256, 2
    head_dim = d_model // n_heads

    key = jax.random.PRNGKey(0)
    keys = jax.random.split(key, 9)
    init = 1.0 / math.sqrt(d_model)
    u = lambda kk, shape: jax.random.uniform(kk, shape, jnp.float32, -init, init)
    params = {
        "wq": u(keys[0], (d_model, d_model)), "bq": u(keys[1], (d_model,)),
        "wk": u(keys[2], (d_model, d_model)), "bk": u(keys[3], (d_model,)),
        "wv": u(keys[4], (d_model, d_model)), "bv": u(keys[5], (d_model,)),
        "wo": u(keys[6], (d_model, d_model)), "bo": u(keys[7], (d_model,)),
    }
    x = jax.random.normal(keys[8], (batch, seq, d_model), jnp.float32)

    out, attn_dist = mha_forward(params, n_heads, x, x, x, mask=None)
    out = jax.block_until_ready(out)
    attn_dist = jax.block_until_ready(attn_dist)

    # -------- pure-JAX reference (same math as the PyTorch module) --------
    def ref_forward(xin, mask=None):
        q = xin @ params["wq"].T + params["bq"]
        k = xin @ params["wk"].T + params["bk"]
        v = xin @ params["wv"].T + params["bv"]
        heads = lambda t: t.reshape(batch, seq, n_heads, head_dim).transpose(0, 2, 1, 3)
        q, k, v = heads(q), heads(k), heads(v)
        half = head_dim // 2
        inv_freq = 1.0 / (10000.0 ** (jnp.arange(half, dtype=jnp.float32) / half))
        t_idx = jnp.arange(seq, dtype=jnp.float32)
        freqs = t_idx[:, None] * inv_freq[None, :]
        cos, sin = jnp.cos(freqs)[None, None], jnp.sin(freqs)[None, None]

        def rope(t):
            t1, t2 = t[..., :half], t[..., half:]
            return jnp.concatenate([t1 * cos - t2 * sin, t1 * sin + t2 * cos], -1)

        q, k = rope(q), rope(k)
        s = jnp.einsum("bhqd,bhkd->bhqk", q, k) / math.sqrt(head_dim)
        if mask is not None:
            s = jnp.where(mask, -1e10, s)
        p = jax.nn.softmax(s, axis=-1)
        o = jnp.einsum("bhqk,bhkd->bhqd", p, v)
        o = o.transpose(0, 2, 1, 3).reshape(batch, seq, d_model)
        return o @ params["wo"].T + params["bo"], p

    ref_out, ref_p = ref_forward(x)
    assert out.shape == (batch, seq, d_model)
    assert attn_dist.shape == (batch, n_heads, seq, seq)
    # Tolerance accommodates MXU precision + approx reciprocal in the softmax.
    assert jnp.allclose(out, ref_out, atol=1e-2, rtol=1e-2), \
        float(jnp.max(jnp.abs(out - ref_out)))
    assert jnp.allclose(attn_dist, ref_p, atol=1e-2, rtol=1e-2)

    # Also exercise the masked path (masked_fill(mask, -1e10) semantics).
    causal = jnp.triu(jnp.ones((seq, seq), jnp.bool_), k=1)[None, None]
    out_m, p_m = mha_forward(params, n_heads, x, x, x, mask=causal)
    out_m = jax.block_until_ready(out_m)
    ref_out_m, ref_p_m = ref_forward(x, mask=causal)
    assert jnp.allclose(out_m, ref_out_m, atol=1e-2, rtol=1e-2)
    assert jnp.allclose(p_m, ref_p_m, atol=1e-2, rtol=1e-2)

    print("KERNEL_OK")
</pallas_src>

<mosaic_0001>
module attributes {stable_mosaic.version = 11 : i64} {
  func.func @_linear_kernel(%arg0: i32, %arg1: i32, %arg2: memref<16x256xf32, #tpu.memory_space<vmem>>, %arg3: memref<256x256xf32, #tpu.memory_space<vmem>>, %arg4: memref<1x256xf32, #tpu.memory_space<vmem>>, %arg5: memref<16x256xf32, #tpu.memory_space<vmem>>) attributes {dimension_semantics = [#tpu.dimension_semantics<parallel>, #tpu.dimension_semantics<parallel>], iteration_bounds = array<i64: 1, 3>, scalar_prefetch = 0 : i64, scratch_operands = 0 : i64, tpu.core_type = #tpu.core_type<tc>, window_params = [{transform_indices = @transform_0, window_bounds = array<i64: 16, 256>}, {transform_indices = @transform_1, window_bounds = array<i64: 256, 256>}, {transform_indices = @transform_2, window_bounds = array<i64: 1, 256>}, {transform_indices = @transform_3, window_bounds = array<i64: 16, 256>}]} {
    %c0 = arith.constant 0 : index
    %c0_0 = arith.constant 0 : index
    %0 = vector.load %arg2[%c0, %c0_0] : memref<16x256xf32, #tpu.memory_space<vmem>>, vector<16x256xf32>
    %c0_1 = arith.constant 0 : index
    %c0_2 = arith.constant 0 : index
    %1 = vector.load %arg3[%c0_1, %c0_2] : memref<256x256xf32, #tpu.memory_space<vmem>>, vector<256x256xf32>
    %cst = arith.constant dense<0.000000e+00> : vector<16x256xf32>
    %2 = tpu.matmul %0, %1, %cst {dimension_numbers = #tpu.dot_dimension_numbers<[1], [0], [0], [1], [0, 0, 1, 1], [], []>} : vector<16x256xf32>, vector<256x256xf32>, vector<16x256xf32> -> vector<16x256xf32>
    %c0_3 = arith.constant 0 : index
    %c0_4 = arith.constant 0 : index
    %3 = vector.load %arg4[%c0_3, %c0_4] : memref<1x256xf32, #tpu.memory_space<vmem>>, vector<1x256xf32>
    %4 = vector.broadcast %3 : vector<1x256xf32> to vector<16x256xf32>
    %5 = arith.addf %2, %4 : vector<16x256xf32>
    %c0_5 = arith.constant 0 : index
    %c0_6 = arith.constant 0 : index
    %6 = vector.load %arg5[%c0_5, %c0_6] : memref<16x256xf32, #tpu.memory_space<vmem>>, vector<16x256xf32>
    tpu.vector_store %arg5[%c0_5, %c0_6], %5 {strides = array<i32>} : memref<16x256xf32, #tpu.memory_space<vmem>>, vector<16x256xf32>,
    return
  }
  func.func @transform_0(%arg0: i32, %arg1: i32) -> (i32, i32) {
    %c0_i32 = arith.constant 0 : i32
    %c0_i32_0 = arith.constant 0 : i32
    return %arg0, %c0_i32 : i32, i32
  }
  func.func @transform_1(%arg0: i32, %arg1: i32) -> (i32, i32) {
    %c0_i32 = arith.constant 0 : i32
    %c0_i32_0 = arith.constant 0 : i32
    return %c0_i32, %arg1 : i32, i32
  }
  func.func @transform_2(%arg0: i32, %arg1: i32) -> (i32, i32) {
    %c0_i32 = arith.constant 0 : i32
    %c0_i32_0 = arith.constant 0 : i32
    return %c0_i32, %arg1 : i32, i32
  }
  func.func @transform_3(%arg0: i32, %arg1: i32) -> (i32, i32) {
    %c0_i32 = arith.constant 0 : i32
    return %arg0, %arg1 : i32, i32
  }
}

</mosaic_0001>

<bundles_post_ra>
// kernel: tpu_custom_call.1
= control target key start
LH: loop header
LB: loop body
LE: loop exit
PB: predicated region body
PF: predicated region fallthrough
CT: control target
= control target key end

     0   :  { %s1213_s0 = inlined_call_operand.hbm [shape: f32[16,256], index: 0, kind: input, shape index: {}]   ;;  %s1214_s1 = inlined_call_operand.hbm [shape: f32[256,768], index: 1, kind: input, shape index: {}]   ;;  %s1215_s2 = inlined_call_operand.hbm [shape: f32[1,768], index: 2, kind: input, shape index: {}]   ;;  %s1216_s3 = inlined_call_operand.hbm [shape: f32[16,768], index: 3, kind: output, shape index: {}]  }
   0x1   :  { %1222 = sst [smem:[#allocation12_spill]] %s1214_s1 }
   0x2   :  { %8 = vsyncpa [#allocation3], 0 }
   0x3   :  { %9 = vsyncpa [#allocation6], 0 }
   0x4   :  { %11 = vsyncpa [#allocation6 + $0x1], 0 }
   0x5   :  { %12 = vsyncpa [#allocation4], 0 }
   0x6   :  { %14 = vsyncpa [#allocation4 + $0x1], 0  ;;  %s933_s12 = smov 0   ;;  %s935_s13 = smov 0  }
   0x7   :  { %s937_s14 = smov 0   ;;  %s939_s15 = smov 0  }
   0x8   :  { %s941_s16 = smov 0   ;;  %s943_s17 = smov 0  }
   0x9 LB: > { %s29_s18 = sadd.s32 1, %s897_s16  ;;  %s65_s19 = sadd.s32 1, %s889_s14  ;;  %s901_s17 = sphi %s943_s17, %s20_s17   ;;  %s897_s16 = sphi %s941_s16, %s1242_s16   ;;  %s893_s15 = sphi %s939_s15, %s1241_s15   ;;  %s889_s14 = sphi %s937_s14, %s1240_s14   ;;  %s885_s13 = sphi %s935_s13, %s1239_s13   ;;  %s881_s12 = sphi %s933_s12, %s1238_s12  }
   0xa   : > { %p30_p0 = scmp.ge.s32.totalorder %s29_s18, 3  ;;  %p72_p1 = scmp.ne.s32.totalorder %s889_s14, %s885_s13 }
   0xb   : > { %p73_p2 = scmp.eq.s32.totalorder %s901_s17, 0  ;;  %p677_p5 = scmp.lt.s32.totalorder %s901_s17, 3 }
   0xc   : > { %s1244_s18 = smov (%p30_p0, %s29_s18), 0  ;;  %s173_s22 = sand.u32 1, %s901_s17  }
   0xd   : > { %p973_p3 = por %p73_p2, %p72_p1  ;;  %s62_s21 = ssub.s32 %s897_s16, %s1244_s18 }
   0xe   : > { %p63_p4 = scmp.eq.s32.totalorder %s62_s21, 0  ;;  %s175_s23 = sand.u32 1, %s889_s14  }
   0xf   : > { %s568_s25 = sshll.u32 %s175_s23, 9  ;;  %s584_s26 = sshll.u32 %s897_s16, 8 }
  0x10   : > { %s983_s24 = scalar_select %p63_p4, %s889_s14, %s65_s19  }
  0x11   : > { %s1224_s1 = sld [smem:[#allocation12_spill]]  ;;  %s177_s30 = scalar_lea.vmem [#allocation5], %s568_s25 }
  0x12   : > { %s184_s4 = sshll.u32 %s177_s30, 4  ;;  %p993_p6 = pnand %p677_p5, %p973_p3  ;;  %s185_s4 = int_to_ptr.vmem [resolvable:$true] %s184_s4 }
  0x13   : > { %s997_s6 = scalar_lea.sflag [#allocation6], %s173_s22  ;;  %s748_s7 = scalar_lea.vmem %s185_s4, 8192 }
  0x14   : > { %p737_p7 = pneg %p993_p6  ;;  %p749_p8 = scmp.ne.s32.totalorder %s185_s4, %s748_s7 }
  0x15   : > { %s903_s8 = smov [#allocation5]  }
  0x16   : > { %p751_p9 = pnand %p749_p8, %p737_p7  ;;  %s753_s9 = sshll.u32 %s903_s8, 4  ;;  %s754_s9 = int_to_ptr.vmem [resolvable:$false] %s753_s9 }
  0x17   : > { %s183_s29 = scalar_lea.hbm %s1224_s1, %s584_s26  ;;  %s755_s10 = scalar_lea.vmem %s754_s9, 16384 }
  0x18   : > { %p752_p10 = pneg %p751_p9  ;;  %p756_p11 = scmp.lt.s32.totalorder %s185_s4, %s754_s9 }
  0x19   : > { %p757_p12 = scmp.lt.s32.totalorder %s755_s10, %s748_s7 }
  0x1b   : > { %p758_p13 = por %p757_p12, %p756_p11 }
  0x1d   : > { %p759_p0 = pnand %p758_p13, %p752_p10 }
  0x1f   : > { %762 = shalt.err (!%p759_p0)
}
  0x20   : > { %s904_s11 = smov 768   ;;  %s1217_s19 = smov 256  }
  0x21   : > { %s1218_s20 = smov 16   ;;  %s1010_s21 = sadd.s32 4294967295, %s901_s17  }
  0x22   : > { %668 = dma.hbm_to_vmem [thread:$0]  (!%p993_p6), %s183_s29, 8192, %s185_s4, %s997_s6, %s904_s11, %s1217_s19, %s1218_s20  }
  0x23   : > { %s564_s22 = sadd.s32 4294967294, %s901_s17   ;;  %p78_p2 = scmp.ne.s32.totalorder %s885_s13, %s881_s12 }
  0x24   : > { %p1220_p3 = scmp.eq.s32.totalorder %s1010_s21, 0  ;;  %p130_p4 = scmp.eq.s32.totalorder %s1010_s21, 2 }
  0x25   : > { %p136_p5 = scmp.eq.s32.totalorder %s564_s22, 2  ;;  %p565_p9 = scmp.ge.s32.totalorder %s901_s17, 1 }
  0x26   : > { %p1019_p8 = por %p1220_p3, %p78_p2  ;;  %p1027_p10 = por %p130_p4, %p72_p1 }
  0x27   : > { %p1031_p11 = por %p136_p5, %p78_p2  ;;  %p143_p12 = scmp.lt.s32.totalorder %s901_s17, 4 }
  0x28   : > { %s1226_s25 = scalar_select %p1019_p8, 1, 0 }
  0x29   : > { %s1227_s26 = scalar_select %p1027_p10, 1, 0 }
  0x2a   : > { %s1228_s27 = scalar_select %p1031_p11, 1, 0 }
  0x2b   : > { %s571_s28 = sshll.u32 %s175_s23, 1  ;;  %p1038_p13 = pnand %p565_p9, %p143_p12 }
  0x2c   : > { %s907_s30 = smov [#allocation2]   ;;  %s585_s7 = sshll.u32 %s897_s16, 5 }
  0x2d   : > { %s159_s4 = sshll.u32 %s907_s30, 4  ;;  %p661_p1 = pneg %p1038_p13  ;;  %s1042_s4 = int_to_ptr.vmem [resolvable:$true] %s159_s4 }
  0x2e   : > { %s204_s10 = scalar_lea.hbm %s1215_s2, %s585_s7  ;;  %s198_s11 = scalar_lea.vmem [#allocation7], %s571_s28 }
  0x2f   : > { %s206_s22 = sshll.u32 %s198_s11, 4  ;;  %p1052_p0 = pnand %p661_p1, %p1220_p3  ;;  %s207_s22 = int_to_ptr.vmem [resolvable:$true] %s206_s22 }
  0x30   : > { %s776_s19 = scalar_lea.vmem %s207_s22, 32  ;;  %s908_s30 = smov [#allocation7]  }
  0x31   : > { %p777_p2 = scmp.ne.s32.totalorder %s207_s22, %s776_s19  ;;  %s781_s20 = sshll.u32 %s908_s30, 4  ;;  %s782_s20 = int_to_ptr.vmem [resolvable:$false] %s781_s20 }
  0x32   : > { %s783_s1 = scalar_lea.vmem %s782_s20, 64  ;;  %p784_p9 = scmp.lt.s32.totalorder %s207_s22, %s782_s20 }
  0x33   : > { %p779_p4 = pnand %p777_p2, %p737_p7  ;;  %p785_p12 = scmp.lt.s32.totalorder %s783_s1, %s776_s19 }
  0x35   : > { %p780_p5 = pneg %p779_p4  ;;  %p786_p11 = por %p785_p12, %p784_p9 }
  0x37   : > { %p787_p10 = pnand %p786_p11, %p780_p5 }
  0x39   : > { %790 = shalt.err (!%p787_p10)
}
  0x3a   : > { %671 = dma.hbm_to_vmem [thread:$0]  (!%p993_p6), %s204_s10, 32, %s207_s22, %s997_s6  }
  0x3b   : > { %p793_p7 = pneg %p1052_p0  ;;  %s802_s28 = scalar_lea.vmem %s1042_s4, 512 }
  0x3c   : > { %p803_p1 = scmp.ne.s32.totalorder %s1042_s4, %s802_s28  ;;  %p810_p3 = scmp.lt.s32.totalorder %s1042_s4, %s1042_s4 }
  0x3d   : > { %p811_p8 = scmp.lt.s32.totalorder %s802_s28, %s802_s28 }
  0x3e   : > { %p805_p2 = pnand %p803_p1, %p793_p7 }
  0x3f   : > { %p812_p9 = por %p811_p8, %p810_p3 }
  0x40   : > { %p806_p4 = pneg %p805_p2 }
  0x42   : > { %p813_p11 = pnand %p812_p9, %p806_p4 }
  0x44   : > { %816 = shalt.err (!%p813_p11)
}
  0x45   : > { %s1231_s1 = smov 16   ;;  %s1232_s5 = smov 256  }
  0x46   : > { %664 = dma.hbm_to_vmem [thread:$0]  (!%p1052_p0), %s1213_s0, 512, %s1042_s4, [#allocation3], %s1232_s5, %s1232_s5, %s1231_s1  }
  0x47   : > { %215 = sbr.rel (%p1038_p13) target bundleno = 360 (0x168), region = 32  ;;  %p1233_p6 = scmp.eq.s32.totalorder (!%p1038_p13), %s1010_s21, 0 }
  0x4c   : > { %868 = dma.done.wait (%p1233_p6), [#allocation3], 512   ;;  %p1234_p3 = pmov %p1233_p6 }
  0x4d   : > { %s221_s20 = sand.u32 1, %s1010_s21   ;;  %s1085_s7 = sand.u32 1, %s885_s13  }
  0x4e   : > { %870 = vsyncadd (%p1234_p3), [#allocation3], 4294966784  ;;  %s576_s8 = sshll.u32 %s1085_s7, 9  ;;  %s222_s9 = scalar_lea.sflag [#allocation6], %s221_s20 }
  0x4f   : > { %s1088_s10 = scalar_lea.vmem [#allocation5], %s576_s8  ;;  %p1235_p8 = scmp.ne.s32.totalorder %s1226_s25, 0 }
  0x51   : > { %872 = dma.done.wait (%p1235_p8), %s222_s9, 8224  }
  0x52   : > { %874 = vsyncadd (%p1235_p8), %s222_s9, 4294959072  ;;  %v302_v0 = vld [vmem:[%s1088_s10 + $0xf8] sm:$0xff]  ;;  %v301_v1 = vld [vmem:[%s1088_s10 + $0xf0] sm:$0xff]  ;;  %s577_s21 = sshll.u32 %s1085_s7, 1  ;;  %s578_s25 = sshll.u32 %s1085_s7, 5 }
  0x53   : > { %v300_v2 = vld [vmem:[%s1088_s10 + $0xe8] sm:$0xff]  ;;  %347 = vmatprep.subr.mxu0 %v302_v0  ;;  %587 = vmatprep.subr.mxu1 %v302_v0  ;;  %v299_v3 = vld [vmem:[%s1088_s10 + $0xe0] sm:$0xff]  ;;  %v298_v4 = vld [vmem:[%s1088_s10 + $0xd8] sm:$0xff]  ;;  %s234_s29 = scalar_lea.vmem [#allocation7], %s577_s21  ;;  %s261_s4 = scalar_lea.vmem [#allocation8], %s578_s25 }
  0x54   : > { %348 = vmatpush1.msra.mxu0 %v301_v1  ;;  %619 = vmatpush1.msra.mxu1 %v301_v1  ;;  %v297_v5 = vld [vmem:[%s1088_s10 + $0xd0] sm:$0xff]  ;;  %v296_v6 = vld [vmem:[%s1088_s10 + $0xc8] sm:$0xff]  ;;  %v295_v7 = vld [vmem:[%s1088_s10 + $0xc0] sm:$0xff]  ;;  %s445_s11 = sshll.u32 %s261_s4, 4  ;;  %s586_s22 = sshll.u32 %s893_s15, 8  ;;  %s1161_s11 = int_to_ptr.vmem [resolvable:$true] %s445_s11 }
  0x55   : > { %349 = vmatprep.subr.mxu0 %v300_v2  ;;  %588 = vmatprep.subr.mxu1 %v300_v2  ;;  %v294_v8 = vld [vmem:[%s1088_s10 + $0xb8] sm:$0xff]  ;;  %v293_v9 = vld [vmem:[%s1088_s10 + $0xb0] sm:$0xff]  ;;  %v292_v10 = vld [vmem:[%s1088_s10 + $0xa8] sm:$0xff]  ;;  %s1166_s28 = scalar_lea.hbm %s1216_s3, %s586_s22  ;;  %s429_s15 = scalar_lea.sflag [#allocation4], %s1085_s7 }
  0x56   : > { %350 = vmatpush1.msra.mxu0 %v299_v3  ;;  %620 = vmatpush1.msra.mxu1 %v299_v3  ;;  %v291_v11 = vld [vmem:[%s1088_s10 + $0xa0] sm:$0xff]  ;;  %v290_v12 = vld [vmem:[%s1088_s10 + $0x98] sm:$0xff]  ;;  %v289_v13 = vld [vmem:[%s1088_s10 + $0x90] sm:$0xff]  ;;  %s817_s1 = scalar_lea.vmem %s1161_s11, 512  ;;  %p1236_p13 = scmp.ne.s32.totalorder %s1227_s26, 0 }
  0x57   : > { %351 = vmatprep.subr.mxu0 %v298_v4  ;;  %589 = vmatprep.subr.mxu1 %v298_v4  ;;  %v288_v14 = vld [vmem:[%s1088_s10 + $0x88] sm:$0xff]  ;;  %v287_v15 = vld [vmem:[%s1088_s10 + $0x80] sm:$0xff]  ;;  %v286_v16 = vld [vmem:[%s1088_s10 + $0x78] sm:$0xff]  ;;  %v337_v4 = vlaneseq  ;;  %p818_p10 = scmp.ne.s32.totalorder %s1161_s11, %s817_s1  ;;  %s909_s5 = smov [#allocation8]  }
  0x58   : > { %352 = vmatpush1.msra.mxu0 %v297_v5  ;;  %621 = vmatpush1.msra.mxu1 %v297_v5  ;;  %v285_v17 = vld [vmem:[%s1088_s10 + $0x70] sm:$0xff]  ;;  %v284_v18 = vld [vmem:[%s1088_s10 + $0x68] sm:$0xff]  ;;  %v283_v19 = vld [vmem:[%s1088_s10 + $0x60] sm:$0xff]  ;;  %s821_s19 = sshll.u32 %s909_s5, 4  ;;  %s822_s19 = int_to_ptr.vmem [resolvable:$false] %s821_s19 }
  0x59   : > { %353 = vmatprep.subr.mxu0 %v296_v6  ;;  %590 = vmatprep.subr.mxu1 %v296_v6  ;;  %v282_v20 = vld [vmem:[%s1088_s10 + $0x58] sm:$0xff]  ;;  %v281_v21 = vld [vmem:[%s1088_s10 + $0x50] sm:$0xff]  ;;  %v280_v22 = vld [vmem:[%s1088_s10 + $0x48] sm:$0xff]  ;;  %v338_v5 = vshrl.u32 %v337_v4, 7  ;;  %p819_p0 = pnand %p818_p10, %p1236_p13  ;;  %s823_s6 = scalar_lea.vmem %s822_s19, 1024 }
  0x5a   : > { %354 = vmatpush1.msra.mxu0 %v295_v7  ;;  %622 = vmatpush1.msra.mxu1 %v295_v7  ;;  %v279_v23 = vld [vmem:[%s1088_s10 + $0x40] sm:$0xff]  ;;  %v278_v24 = vld [vmem:[%s1088_s10 + $0x38] sm:$0xff]  ;;  %v277_v25 = vld [vmem:[%s1088_s10 + $0x30] sm:$0xff]  ;;  %p824_p12 = scmp.lt.s32.totalorder %s1161_s11, %s822_s19  ;;  %p825_p7 = scmp.lt.s32.totalorder %s823_s6, %s817_s1 }
  0x5b   : > { %355 = vmatprep.subr.mxu0 %v294_v8  ;;  %591 = vmatprep.subr.mxu1 %v294_v8  ;;  %v276_v26 = vld [vmem:[%s1088_s10 + $0x28] sm:$0xff]  ;;  %v275_v27 = vld [vmem:[%s1088_s10 + $0x20] sm:$0xff]  ;;  %v274_v28 = vld [vmem:[%s1088_s10 + $0x18] sm:$0xff]  ;;  %v339_v6 = vsub.s32 0, %v338_v5  ;;  %v343_v8 = vsub.s32 1, %v338_v5  ;;  %p820_p5 = pneg %p819_p0 }
  0x5c   : > { %356 = vmatpush1.msra.mxu0 %v293_v9  ;;  %623 = vmatpush1.msra.mxu1 %v293_v9  ;;  %v273_v29 = vld [vmem:[%s1088_s10 + $0x10] sm:$0xff]  ;;  %v272_v30 = vld [vmem:[%s1088_s10 + $0x8] sm:$0xff]  ;;  %v271_v31 = vld [vmem:[%s1088_s10] sm:$0xff]  ;;  %p826_p1 = por %p825_p7, %p824_p12 }
  0x5d   : > { %357 = vmatprep.subr.mxu0 %v292_v10  ;;  %592 = vmatprep.subr.mxu1 %v292_v10  ;;  %v334_v32 = vld [vmem:[%s1088_s10 + $0x1f8] sm:$0xff]  ;;  %v333_v33 = vld [vmem:[%s1088_s10 + $0x1f0] sm:$0xff]  ;;  %v332_v34 = vld [vmem:[%s1088_s10 + $0x1e8] sm:$0xff] }
  0x5e   : > { %358 = vmatpush1.msra.mxu0 %v291_v11  ;;  %624 = vmatpush1.msra.mxu1 %v291_v11  ;;  %v331_v35 = vld [vmem:[%s1088_s10 + $0x1e0] sm:$0xff]  ;;  %v330_v36 = vld [vmem:[%s1088_s10 + $0x1d8] sm:$0xff]  ;;  %v329_v37 = vld [vmem:[%s1088_s10 + $0x1d0] sm:$0xff]  ;;  %p827_p2 = pnand %p826_p1, %p820_p5 }
  0x5f   : > { %359 = vmatprep.subr.mxu0 %v290_v12  ;;  %593 = vmatprep.subr.mxu1 %v290_v12  ;;  %v328_v38 = vld [vmem:[%s1088_s10 + $0x1c8] sm:$0xff]  ;;  %v327_v39 = vld [vmem:[%s1088_s10 + $0x1c0] sm:$0xff]  ;;  %v326_v40 = vld [vmem:[%s1088_s10 + $0x1b8] sm:$0xff] }
  0x60   : > { %360 = vmatpush1.msra.mxu0 %v289_v13  ;;  %625 = vmatpush1.msra.mxu1 %v289_v13  ;;  %v325_v41 = vld [vmem:[%s1088_s10 + $0x1b0] sm:$0xff]  ;;  %v324_v42 = vld [vmem:[%s1088_s10 + $0x1a8] sm:$0xff]  ;;  %v323_v43 = vld [vmem:[%s1088_s10 + $0x1a0] sm:$0xff] }
  0x61   : > { %361 = vmatprep.subr.mxu0 %v288_v14  ;;  %594 = vmatprep.subr.mxu1 %v288_v14  ;;  %v322_v44 = vld [vmem:[%s1088_s10 + $0x198] sm:$0xff]  ;;  %v321_v45 = vld [vmem:[%s1088_s10 + $0x190] sm:$0xff]  ;;  %v320_v46 = vld [vmem:[%s1088_s10 + $0x188] sm:$0xff] }
  0x62   : > { %362 = vmatpush1.msra.mxu0 %v287_v15  ;;  %626 = vmatpush1.msra.mxu1 %v287_v15  ;;  %v319_v47 = vld [vmem:[%s1088_s10 + $0x180] sm:$0xff]  ;;  %v318_v48 = vld [vmem:[%s1088_s10 + $0x178] sm:$0xff]  ;;  %v317_v49 = vld [vmem:[%s1088_s10 + $0x170] sm:$0xff] }
  0x63   : > { %363 = vmatprep.subr.mxu0 %v286_v16  ;;  %595 = vmatprep.subr.mxu1 %v286_v16  ;;  %v316_v50 = vld [vmem:[%s1088_s10 + $0x168] sm:$0xff]  ;;  %v315_v51 = vld [vmem:[%s1088_s10 + $0x160] sm:$0xff]  ;;  %v314_v52 = vld [vmem:[%s1088_s10 + $0x158] sm:$0xff] }
  0x64   : > { %364 = vmatpush1.msra.mxu0 %v285_v17  ;;  %627 = vmatpush1.msra.mxu1 %v285_v17  ;;  %v313_v53 = vld [vmem:[%s1088_s10 + $0x150] sm:$0xff]  ;;  %v312_v54 = vld [vmem:[%s1088_s10 + $0x148] sm:$0xff]  ;;  %v311_v55 = vld [vmem:[%s1088_s10 + $0x140] sm:$0xff] }
  0x65   : > { %365 = vmatprep.subr.mxu0 %v284_v18  ;;  %596 = vmatprep.subr.mxu1 %v284_v18  ;;  %v310_v56 = vld [vmem:[%s1088_s10 + $0x138] sm:$0xff]  ;;  %v309_v57 = vld [vmem:[%s1088_s10 + $0x130] sm:$0xff]  ;;  %v308_v58 = vld [vmem:[%s1088_s10 + $0x128] sm:$0xff] }
  0x66   : > { %366 = vmatpush1.msra.mxu0 %v283_v19  ;;  %628 = vmatpush1.msra.mxu1 %v283_v19  ;;  %v307_v59 = vld [vmem:[%s1088_s10 + $0x120] sm:$0xff]  ;;  %v306_v60 = vld [vmem:[%s1088_s10 + $0x118] sm:$0xff]  ;;  %v305_v61 = vld [vmem:[%s1088_s10 + $0x110] sm:$0xff] }
  0x67   : > { %367 = vmatprep.subr.mxu0 %v282_v20  ;;  %597 = vmatprep.subr.mxu1 %v282_v20  ;;  %v304_v62 = vld [vmem:[%s1088_s10 + $0x108] sm:$0xff]  ;;  %v303_v63 = vld [vmem:[%s1088_s10 + $0x100] sm:$0xff]  ;;  %v270_v1 = vld [vmem:[#allocation2 + $0x18] sm:$0xff] }
  0x68   : > { %368 = vmatpush1.msra.mxu0 %v281_v21  ;;  %629 = vmatpush1.msra.mxu1 %v281_v21  ;;  %v268_v0 = vld [vmem:[#allocation2 + $0x8] sm:$0xff]  ;;  %v267_v2 = vld [vmem:[#allocation2] sm:$0xff]  ;;  %v269_v3 = vld [vmem:[#allocation2 + $0x10] sm:$0xff] }
  0x69   : > { %369 = vmatprep.subr.mxu0 %v280_v22  ;;  %598 = vmatprep.subr.mxu1 %v280_v22  ;;  %v335_v7 = vld [vmem:[%s234_s29] sm:$0x3] }
  0x6a   : > { %370 = vmatpush1.msra.mxu0 %v279_v23  ;;  %630 = vmatpush1.msra.mxu1 %v279_v23  ;;  %v340_v9 = vrot.slane %v335_v7, %v339_v6  ;;  %v344_v10 = vrot.slane %v335_v7, %v343_v8 }
  0x6b   : > { %371 = vmatprep.subr.mxu0 %v278_v24  ;;  %599 = vmatprep.subr.mxu1 %v278_v24 }
  0x6c   : > { %372 = vmatpush1.msra.mxu0 %v277_v25  ;;  %631 = vmatpush1.msra.mxu1 %v277_v25 }
  0x6d   : > { %373 = vmatprep.subr.mxu0 %v276_v26  ;;  %600 = vmatprep.subr.mxu1 %v276_v26 }
  0x6e   : > { %374 = vmatpush1.msra.mxu0 %v275_v27  ;;  %632 = vmatpush1.msra.mxu1 %v275_v27 }
  0x6f   : > { %375 = vmatprep.subr.mxu0 %v274_v28  ;;  %601 = vmatprep.subr.mxu1 %v274_v28 }
  0x70   : > { %376 = vmatpush1.msra.mxu0 %v273_v29  ;;  %633 = vmatpush1.msra.mxu1 %v273_v29 }
  0x71   : > { %377 = vmatprep.subr.mxu0 %v272_v30  ;;  %602 = vmatprep.subr.mxu1 %v272_v30 }
  0x72   : > { %378 = vmatpush1.msra.mxu0 %v271_v31  ;;  %634 = vmatpush1.msra.mxu1 %v271_v31 }
  0x73   : > { %379 = vmatprep.subr.mxu0 %v334_v32  ;;  %603 = vmatprep.subr.mxu1 %v334_v32 }
  0x74   : > { %380 = vmatpush2.msra.mxu0 %v333_v33  ;;  %635 = vmatpush2.msra.mxu1 %v333_v33 }
  0x75   : > { %381 = vmatprep.subr.mxu0 %v332_v34  ;;  %604 = vmatprep.subr.mxu1 %v332_v34 }
  0x76   : > { %382 = vmatpush2.msra.mxu0 %v331_v35  ;;  %636 = vmatpush2.msra.mxu1 %v331_v35 }
  0x77   : > { %383 = vmatprep.subr.mxu0 %v330_v36  ;;  %605 = vmatprep.subr.mxu1 %v330_v36 }
  0x78   : > { %384 = vmatpush2.msra.mxu0 %v329_v37  ;;  %637 = vmatpush2.msra.mxu1 %v329_v37 }
  0x79   : > { %385 = vmatprep.subr.mxu0 %v328_v38  ;;  %606 = vmatprep.subr.mxu1 %v328_v38 }
  0x7a   : > { %386 = vmatpush2.msra.mxu0 %v327_v39  ;;  %638 = vmatpush2.msra.mxu1 %v327_v39 }
  0x7b   : > { %387 = vmatprep.subr.mxu0 %v326_v40  ;;  %607 = vmatprep.subr.mxu1 %v326_v40 }
  0x7c   : > { %388 = vmatpush2.msra.mxu0 %v325_v41  ;;  %639 = vmatpush2.msra.mxu1 %v325_v41 }
  0x7d   : > { %389 = vmatprep.subr.mxu0 %v324_v42  ;;  %608 = vmatprep.subr.mxu1 %v324_v42 }
  0x7e   : > { %390 = vmatpush2.msra.mxu0 %v323_v43  ;;  %640 = vmatpush2.msra.mxu1 %v323_v43 }
  0x7f   : > { %391 = vmatprep.subr.mxu0 %v322_v44  ;;  %609 = vmatprep.subr.mxu1 %v322_v44 }
  0x80   : > { %392 = vmatpush2.msra.mxu0 %v321_v45  ;;  %641 = vmatpush2.msra.mxu1 %v321_v45 }
  0x81   : > { %393 = vmatprep.subr.mxu0 %v320_v46  ;;  %610 = vmatprep.subr.mxu1 %v320_v46 }
  0x82   : > { %394 = vmatpush2.msra.mxu0 %v319_v47  ;;  %642 = vmatpush2.msra.mxu1 %v319_v47 }
  0x83   : > { %395 = vmatprep.subr.mxu0 %v318_v48  ;;  %611 = vmatprep.subr.mxu1 %v318_v48 }
  0x84   : > { %396 = vmatpush2.msra.mxu0 %v317_v49  ;;  %643 = vmatpush2.msra.mxu1 %v317_v49 }
  0x85   : > { %397 = vmatprep.subr.mxu0 %v316_v50  ;;  %612 = vmatprep.subr.mxu1 %v316_v50 }
  0x86   : > { %398 = vmatpush2.msra.mxu0 %v315_v51  ;;  %644 = vmatpush2.msra.mxu1 %v315_v51 }
  0x87   : > { %399 = vmatprep.subr.mxu0 %v314_v52  ;;  %613 = vmatprep.subr.mxu1 %v314_v52 }
  0x88   : > { %400 = vmatpush2.msra.mxu0 %v313_v53  ;;  %645 = vmatpush2.msra.mxu1 %v313_v53 }
  0x89   : > { %401 = vmatprep.subr.mxu0 %v312_v54  ;;  %614 = vmatprep.subr.mxu1 %v312_v54 }
  0x8a   : > { %402 = vmatpush2.msra.mxu0 %v311_v55  ;;  %646 = vmatpush2.msra.mxu1 %v311_v55 }
  0x8b   : > { %403 = vmatprep.subr.mxu0 %v310_v56  ;;  %615 = vmatprep.subr.mxu1 %v310_v56 }
  0x8c   : > { %404 = vmatpush2.msra.mxu0 %v309_v57  ;;  %647 = vmatpush2.msra.mxu1 %v309_v57 }
  0x8d   : > { %405 = vmatprep.subr.mxu0 %v308_v58  ;;  %616 = vmatprep.subr.mxu1 %v308_v58 }
  0x8e   : > { %406 = vmatpush2.msra.mxu0 %v307_v59  ;;  %648 = vmatpush2.msra.mxu1 %v307_v59 }
  0x8f   : > { %407 = vmatprep.subr.mxu0 %v306_v60  ;;  %617 = vmatprep.subr.mxu1 %v306_v60 }
  0x90   : > { %408 = vmatpush2.msra.mxu0 %v305_v61  ;;  %649 = vmatpush2.msra.mxu1 %v305_v61 }
  0x91   : > { %409 = vmatprep.subr.mxu0 %v304_v62  ;;  %618 = vmatprep.subr.mxu1 %v304_v62 }
  0x92   : > { %410 = vmatpush2.msra.mxu0 %v303_v63  ;;  %650 = vmatpush2.msra.mxu1 %v303_v63 }
  0x93   : > { %411 = vmatprep.mubr.f32.mxu0 %v268_v0  ;;  %417 = vmatprep.mubr.f32.mxu1 %v270_v1 }
  0x94   : > { %412 = vmatmul.mubr.f32.vlgmr.msra.gmra.mxu0 %v267_v2  ;;  %418 = vmatmul.mubr.f32.vlgmr.msra.gmra.mxu1 %v269_v3 }
 0x154   : > { %v413_v11 = vpop.f32.mrf.mxu0  ;;  %v419_v12 = vpop.f32.mrf.mxu1 }
 0x155   : > { %v414_v13 = vadd.f32 %v413_v11, %v340_v9  ;;  %v420_v14 = vadd.f32 %v419_v12, %v340_v9 }
 0x156   : > { %v415_v15 = vpop.f32.mrf.mxu0  ;;  %v421_v16 = vpop.f32.mrf.mxu1 }
 0x157   : > { %424 = vst [vmem:[%s261_s4] sm:$0xff] %v414_v13  ;;  %426 = vst [vmem:[%s261_s4 + $0x10] sm:$0xff] %v420_v14  ;;  %v416_v17 = vadd.f32 %v415_v15, %v344_v10  ;;  %v422_v18 = vadd.f32 %v421_v16, %v344_v10 }
 0x159   : > { %425 = vst [vmem:[%s261_s4 + $0x8] sm:$0xff] %v416_v17  ;;  %427 = vst [vmem:[%s261_s4 + $0x18] sm:$0xff] %v422_v18 }
 0x15a   : > { %830 = shalt.err (!%p827_p2)
}
 0x15b   : > { %s831_s20 = scalar_lea.hbm %s1166_s28, 512  ;;  %s835_s10 = scalar_lea.hbm %s1216_s3, 1536 }
 0x15c   : > { %p832_p4 = scmp.ne.s32.totalorder %s1166_s28, %s831_s20  ;;  %p836_p6 = scmp.lt.s32.totalorder %s1166_s28, %s1216_s3 }
 0x15d   : > { %p837_p3 = scmp.lt.s32.totalorder %s835_s10, %s831_s20 }
 0x15e   : > { %p833_p9 = pnand %p832_p4, %p1236_p13 }
 0x15f   : > { %p838_p8 = por %p837_p3, %p836_p6 }
 0x160   : > { %p834_p11 = pneg %p833_p9 }
 0x162   : > { %p839_p10 = pnand %p838_p8, %p834_p11 }
 0x164   : > { %842 = shalt.err (!%p839_p10)
}
 0x165   : > { %s910_s29 = smov 256   ;;  %s911_s4 = smov 768  }
 0x166   : > { %s912_s22 = smov 16  }
 0x167   : > { %659 = dma.vmem_to_hbm [thread:$0]  (%p1236_p13), %s1161_s11, 512, %s1166_s28, %s429_s15, %s910_s29, %s911_s4, %s912_s22  }
 0x168 PF: > { %p679_p0 = scmp.ge.s32.totalorder %s901_s17, 2  ;;  %s460_s23 = sand.u32 1, %s881_s12  }
 0x169   : > { %p1237_p5 = scmp.ne.s32.totalorder %s1228_s27, 0  ;;  %s461_s30 = scalar_lea.sflag [#allocation4], %s460_s23 }
 0x16b   : > { %p673_p12 = pnand %p679_p0, %p1237_p5 }
 0x16d   : > { %p674_p7 = pneg %p673_p12 }
 0x16f   : > { %876 = dma.done.wait (%p674_p7), %s461_s30, 512  }
 0x170   : > { %878 = vsyncadd (%p674_p7), %s461_s30, 4294966784  ;;  %s20_s17 = sadd.s32 1, %s901_s17   ;;  %s1238_s12 = smov %s885_s13 }
 0x171   : > { %p17_p1 = scmp.ge.s32.totalorder %s20_s17, 5   ;;  %s1239_s13 = smov %s889_s14 }
 0x172   : > { %s1240_s14 = smov %s983_s24  ;;  %s1241_s15 = smov %s897_s16 }
 0x173   : > { %s1242_s16 = smov %s1244_s18  ;;  %19 = sbr.rel (!%p17_p1) target bundleno = 9 (0x9), region = 94 }
 0x178   :  { %466 = vsyncpa [#allocation3], 1 }
 0x179   :  { %468 = vsyncpa [#allocation3 + $0x1], 1 }
 0x17a   :  { %469 = vsyncpa [#allocation6], 1 }
 0x17b   :  { %471 = vsyncpa [#allocation6 + $0x1], 1 }
 0x17c   :  { %472 = vsyncpa [#allocation4], 1 }
 0x17d   :  { %474 = vsyncpa [#allocation4 + $0x1], 1 }

</bundles_post_ra>
